<compile_context>
chip_gen: v7x
topology: tpu7x:2x2x1
jax: 0.10.0
libtpu: 0.0.40
codegen_flags: <defaults>
</compile_context>

<pallas_src>
import functools

import jax
import jax.numpy as jnp
from jax.experimental import pallas as pl
from jax.experimental.pallas import tpu as pltpu


def _sepconv_kernel(x_ref, wdw_ref, wpw_ref, b_ref, o_ref, *,
                    K, d, pad, TH, W):
    """Fused depthwise + pointwise conv for one (batch, H-tile) grid step.

    x_ref   : (1, Cin, Hp, Wp)   zero-padded input image (resident per batch)
    wdw_ref : (K, K, Cin)        depthwise kernel
    wpw_ref : (Cout, Cin)        pointwise kernel (channels-first)
    b_ref   : (Cout, 1)          fused bias (b_dw @ w_pw + b_pw)
    o_ref   : (1, Cout, TH*W)    output tile, spatial flattened (lane-dense)
    """
    j = pl.program_id(1)
    row0 = pl.multiple_of(j * TH, TH)          # first output row of this tile

    cin = x_ref.shape[1]
    # One lane-aligned load of the TH + 2*pad row slab for this tile.
    x_tile = x_ref[0, :, pl.ds(row0, TH + 2 * pad), :]     # (Cin, TH+2p, Wp)
    wdw = wdw_ref[...]                                     # (K, K, Cin)

    # ---- depthwise conv: unrolled taps on the VPU, f32 accumulation ----
    acc = jnp.zeros((cin, TH, W), jnp.float32)
    for kw in range(K):
        # lane-axis (W) shift hoisted: K shifted slabs instead of K*K
        x_kw = x_tile[:, :, kw * d:kw * d + W]             # (Cin, TH+2p, W)
        for kh in range(K):
            win = x_kw[:, kh * d:kh * d + TH, :]           # (Cin, TH, W)
            w_tap = wdw[kh, kw][:, None, None]             # (Cin, 1, 1)
            acc = acc + win * w_tap                        # accumulate in f32

    # ---- pointwise 1x1 conv: (Cout,Cin) @ (Cin,TH*W) on the MXU ----
    out = jnp.dot(wpw_ref[...].astype(jnp.float32),
                  acc.reshape(cin, TH * W),
                  preferred_element_type=jnp.float32)      # (Cout, TH*W)
    out = out + b_ref[...]                                 # (Cout, 1) bcast
    o_ref[0] = out.astype(o_ref.dtype)


def _pick_tile_h(H, W):
    """Largest H tile that divides H, is a multiple of 8, leaves >=2 tiles,
    and keeps the flattened TH*W output block a multiple of 128 lanes.
    Falls back to the whole H (single tile) otherwise."""
    for th in (128, 64, 32, 16, 8):
        if th < H and H % th == 0 and (th * W) % 128 == 0:
            return th
    return H


def separable_conv(x_nchw, w_dw, b_dw, w_pw, b_pw, *, kernel_size, dilation=1):
    """SeparableConv forward.  x_nchw: (N, Cin, H, W) -> (N, Cout, H, W)."""
    N, Cin, H, W = x_nchw.shape
    K = kernel_size
    assert K % 2 == 1, "padding = K//2*dilation matches PyTorch only for odd K"
    Cout = w_pw.shape[1]
    pad = K // 2 * dilation

    # Zero-pad spatially; layout stays NCHW (no boundary transpose).
    # TODO(synk): fold the halo padding into the kernel (masked taps) to save
    # this remaining HBM round trip of the activation.
    x_pad = jnp.pad(x_nchw, ((0, 0), (0, 0), (pad, pad), (pad, pad)))
    Hp, Wp = H + 2 * pad, W + 2 * pad

    # Channels-first pointwise weight + fused bias (b_dw folded through w_pw).
    w_pw_cf = jnp.transpose(w_pw, (1, 0))                       # (Cout, Cin)
    b_eff = jnp.reshape(jnp.dot(b_dw, w_pw) + b_pw, (Cout, 1))  # (Cout, 1)

    TH = _pick_tile_h(H, W)
    n_th = H // TH

    kernel = functools.partial(_sepconv_kernel, K=K, d=dilation, pad=pad,
                               TH=TH, W=W)

    itemsize = jnp.dtype(x_nchw.dtype).itemsize
    # double-buffered input image + output tile + in-kernel slab/acc (rough)
    block_bytes = (2 * Cin * Hp * Wp + 2 * Cout * TH * W) * itemsize \
        + 2 * Cin * (TH + 2 * pad) * Wp * 4
    vmem_limit = int(min(32 * 2**20, max(4 * 2**20, 4 * block_bytes)))

    flops = N * H * W * Cin * (2 * K * K + 2 * Cout)
    bytes_accessed = (x_pad.size + N * Cout * H * W) * itemsize \
        + (w_dw.size + w_pw.size + Cout) * 4

    out_flat = pl.pallas_call(
        kernel,
        out_shape=jax.ShapeDtypeStruct((N, Cout, H * W), x_nchw.dtype),
        grid=(N, n_th),
        in_specs=[
            # padded image: resident across the inner H-tile axis
            pl.BlockSpec((1, Cin, Hp, Wp), lambda n, j: (n, 0, 0, 0)),
            pl.BlockSpec((K, K, Cin), lambda n, j: (0, 0, 0)),
            pl.BlockSpec((Cout, Cin), lambda n, j: (0, 0)),
            pl.BlockSpec((Cout, 1), lambda n, j: (0, 0)),
        ],
        out_specs=pl.BlockSpec((1, Cout, TH * W), lambda n, j: (n, 0, j)),
        compiler_params=pltpu.CompilerParams(
            dimension_semantics=("parallel", "parallel"),
            vmem_limit_bytes=vmem_limit),
        cost_estimate=pl.CostEstimate(
            flops=flops, transcendentals=0, bytes_accessed=bytes_accessed),
    )(x_pad, w_dw, w_pw_cf, b_eff)

    # Un-flatten the spatial axis (metadata-only reshape, no HBM traffic).
    return out_flat.reshape(N, Cout, H, W)


def _reference(x_nchw, w_dw, b_dw, w_pw, b_pw, *, kernel_size, dilation=1):
    """Pure-JAX reference using lax.conv_general_dilated (matches PyTorch)."""
    N, Cin, H, W = x_nchw.shape
    K = kernel_size
    Cout = w_pw.shape[1]
    pad = K // 2 * dilation
    # depthwise: OIHW weight (Cin, 1, K, K), groups=Cin
    w_dw_oihw = jnp.transpose(w_dw, (2, 0, 1))[:, None, :, :]
    dw = jax.lax.conv_general_dilated(
        x_nchw, w_dw_oihw, window_strides=(1, 1),
        padding=[(pad, pad), (pad, pad)], rhs_dilation=(dilation, dilation),
        feature_group_count=Cin,
        dimension_numbers=("NCHW", "OIHW", "NCHW"))
    dw = dw + b_dw[None, :, None, None]
    # pointwise: OIHW weight (Cout, Cin, 1, 1)
    w_pw_oihw = jnp.transpose(w_pw, (1, 0))[:, :, None, None]
    pw = jax.lax.conv_general_dilated(
        dw, w_pw_oihw, window_strides=(1, 1), padding="VALID",
        dimension_numbers=("NCHW", "OIHW", "NCHW"))
    return pw + b_pw[None, :, None, None]


if __name__ == "__main__":
    # Small shapes consistent with the module: N=2, Cin=4, Cout=8, 16x16, K=3.
    N, Cin, Cout, H, W, K, DIL = 2, 4, 8, 16, 16, 3, 1

    key = jax.random.PRNGKey(0)
    k1, k2, k3, k4, k5 = jax.random.split(key, 5)

    x = jax.random.normal(k1, (N, Cin, H, W), dtype=jnp.float32)
    # Deterministic synthetic parameters (shapes follow nn.Conv2d in __init__).
    w_dw = jax.random.normal(k2, (K, K, Cin), dtype=jnp.float32) * 0.2
    b_dw = jax.random.normal(k3, (Cin,), dtype=jnp.float32) * 0.1
    w_pw = jax.random.normal(k4, (Cin, Cout), dtype=jnp.float32) * 0.2
    b_pw = jax.random.normal(k5, (Cout,), dtype=jnp.float32) * 0.1

    out = separable_conv(x, w_dw, b_dw, w_pw, b_pw,
                         kernel_size=K, dilation=DIL)
    out = jax.block_until_ready(out)

    ref = _reference(x, w_dw, b_dw, w_pw, b_pw, kernel_size=K, dilation=DIL)
    assert out.shape == (N, Cout, H, W)
    assert jnp.allclose(out, ref, atol=1e-4, rtol=1e-4), "mismatch vs reference"

    print("KERNEL_OK")
</pallas_src>

<mosaic_0001>
module attributes {stable_mosaic.version = 11 : i64} {
  func.func @_sepconv_kernel(%arg0: i32, %arg1: i32, %arg2: memref<1x4x18x18xf32, #tpu.memory_space<vmem>>, %arg3: memref<3x3x4xf32, #tpu.memory_space<vmem>>, %arg4: memref<8x4xf32, #tpu.memory_space<vmem>>, %arg5: memref<8x1xf32, #tpu.memory_space<vmem>>, %arg6: memref<1x8x128xf32, #tpu.memory_space<vmem>>) attributes {dimension_semantics = [#tpu.dimension_semantics<parallel>, #tpu.dimension_semantics<parallel>], iteration_bounds = array<i64: 2, 2>, scalar_prefetch = 0 : i64, scratch_operands = 0 : i64, tpu.core_type = #tpu.core_type<tc>, window_params = [{transform_indices = @transform_0, window_bounds = array<i64: 1, 4, 18, 18>}, {pipeline_mode = #tpu.pipeline_mode<synchronous>, transform_indices = @transform_1, window_bounds = array<i64: 3, 3, 4>}, {pipeline_mode = #tpu.pipeline_mode<synchronous>, transform_indices = @transform_2, window_bounds = array<i64: 8, 4>}, {pipeline_mode = #tpu.pipeline_mode<synchronous>, transform_indices = @transform_3, window_bounds = array<i64: 8, 1>}, {transform_indices = @transform_4, window_bounds = array<i64: 1, 8, 128>}]} {
    %c8_i32 = arith.constant 8 : i32
    %0 = arith.muli %arg1, %c8_i32 : i32
    %1 = tpu.assume_multiple %0, 8 : i32
    %c0 = arith.constant 0 : index
    %c0_0 = arith.constant 0 : index
    %2 = arith.index_cast %1 : i32 to index
    %c0_1 = arith.constant 0 : index
    %3 = vector.load %arg2[%c0, %c0_0, %2, %c0_1] : memref<1x4x18x18xf32, #tpu.memory_space<vmem>>, vector<1x4x10x18xf32>
    %4 = vector.shape_cast %3 : vector<1x4x10x18xf32> to vector<4x10x18xf32>
    %c0_2 = arith.constant 0 : index
    %c0_3 = arith.constant 0 : index
    %c0_4 = arith.constant 0 : index
    %5 = vector.load %arg3[%c0_2, %c0_3, %c0_4] : memref<3x3x4xf32, #tpu.memory_space<vmem>>, vector<3x3x4xf32>
    %cst = arith.constant 0.000000e+00 : f32
    %6 = vector.broadcast %cst : f32 to vector<4x8x16xf32>
    %7 = vector.extract_strided_slice %4 {offsets = [0, 0, 0], sizes = [4, 10, 16], strides = [1, 1, 1]} : vector<4x10x18xf32> to vector<4x10x16xf32>
    %8 = vector.extract_strided_slice %7 {offsets = [0, 0, 0], sizes = [4, 8, 16], strides = [1, 1, 1]} : vector<4x10x16xf32> to vector<4x8x16xf32>
    %9 = vector.extract_strided_slice %5 {offsets = [0, 0, 0], sizes = [1, 1, 4], strides = [1, 1, 1]} : vector<3x3x4xf32> to vector<1x1x4xf32>
    %10 = vector.shape_cast %9 : vector<1x1x4xf32> to vector<4xf32>
    %11 = vector.shape_cast %10 : vector<4xf32> to vector<4x1x1xf32>
    %12 = vector.broadcast %11 : vector<4x1x1xf32> to vector<4x8x16xf32>
    %13 = arith.mulf %8, %12 : vector<4x8x16xf32>
    %14 = arith.addf %6, %13 : vector<4x8x16xf32>
    %15 = vector.extract_strided_slice %7 {offsets = [0, 1, 0], sizes = [4, 8, 16], strides = [1, 1, 1]} : vector<4x10x16xf32> to vector<4x8x16xf32>
    %16 = vector.extract_strided_slice %5 {offsets = [1, 0, 0], sizes = [1, 1, 4], strides = [1, 1, 1]} : vector<3x3x4xf32> to vector<1x1x4xf32>
    %17 = vector.shape_cast %16 : vector<1x1x4xf32> to vector<4xf32>
    %18 = vector.shape_cast %17 : vector<4xf32> to vector<4x1x1xf32>
    %19 = vector.broadcast %18 : vector<4x1x1xf32> to vector<4x8x16xf32>
    %20 = arith.mulf %15, %19 : vector<4x8x16xf32>
    %21 = arith.addf %14, %20 : vector<4x8x16xf32>
    %22 = vector.extract_strided_slice %7 {offsets = [0, 2, 0], sizes = [4, 8, 16], strides = [1, 1, 1]} : vector<4x10x16xf32> to vector<4x8x16xf32>
    %23 = vector.extract_strided_slice %5 {offsets = [2, 0, 0], sizes = [1, 1, 4], strides = [1, 1, 1]} : vector<3x3x4xf32> to vector<1x1x4xf32>
    %24 = vector.shape_cast %23 : vector<1x1x4xf32> to vector<4xf32>
    %25 = vector.shape_cast %24 : vector<4xf32> to vector<4x1x1xf32>
    %26 = vector.broadcast %25 : vector<4x1x1xf32> to vector<4x8x16xf32>
    %27 = arith.mulf %22, %26 : vector<4x8x16xf32>
    %28 = arith.addf %21, %27 : vector<4x8x16xf32>
    %29 = vector.extract_strided_slice %4 {offsets = [0, 0, 1], sizes = [4, 10, 16], strides = [1, 1, 1]} : vector<4x10x18xf32> to vector<4x10x16xf32>
    %30 = vector.extract_strided_slice %29 {offsets = [0, 0, 0], sizes = [4, 8, 16], strides = [1, 1, 1]} : vector<4x10x16xf32> to vector<4x8x16xf32>
    %31 = vector.extract_strided_slice %5 {offsets = [0, 1, 0], sizes = [1, 1, 4], strides = [1, 1, 1]} : vector<3x3x4xf32> to vector<1x1x4xf32>
    %32 = vector.shape_cast %31 : vector<1x1x4xf32> to vector<4xf32>
    %33 = vector.shape_cast %32 : vector<4xf32> to vector<4x1x1xf32>
    %34 = vector.broadcast %33 : vector<4x1x1xf32> to vector<4x8x16xf32>
    %35 = arith.mulf %30, %34 : vector<4x8x16xf32>
    %36 = arith.addf %28, %35 : vector<4x8x16xf32>
    %37 = vector.extract_strided_slice %29 {offsets = [0, 1, 0], sizes = [4, 8, 16], strides = [1, 1, 1]} : vector<4x10x16xf32> to vector<4x8x16xf32>
    %38 = vector.extract_strided_slice %5 {offsets = [1, 1, 0], sizes = [1, 1, 4], strides = [1, 1, 1]} : vector<3x3x4xf32> to vector<1x1x4xf32>
    %39 = vector.shape_cast %38 : vector<1x1x4xf32> to vector<4xf32>
    %40 = vector.shape_cast %39 : vector<4xf32> to vector<4x1x1xf32>
    %41 = vector.broadcast %40 : vector<4x1x1xf32> to vector<4x8x16xf32>
    %42 = arith.mulf %37, %41 : vector<4x8x16xf32>
    %43 = arith.addf %36, %42 : vector<4x8x16xf32>
    %44 = vector.extract_strided_slice %29 {offsets = [0, 2, 0], sizes = [4, 8, 16], strides = [1, 1, 1]} : vector<4x10x16xf32> to vector<4x8x16xf32>
    %45 = vector.extract_strided_slice %5 {offsets = [2, 1, 0], sizes = [1, 1, 4], strides = [1, 1, 1]} : vector<3x3x4xf32> to vector<1x1x4xf32>
    %46 = vector.shape_cast %45 : vector<1x1x4xf32> to vector<4xf32>
    %47 = vector.shape_cast %46 : vector<4xf32> to vector<4x1x1xf32>
    %48 = vector.broadcast %47 : vector<4x1x1xf32> to vector<4x8x16xf32>
    %49 = arith.mulf %44, %48 : vector<4x8x16xf32>
    %50 = arith.addf %43, %49 : vector<4x8x16xf32>
    %51 = vector.extract_strided_slice %4 {offsets = [0, 0, 2], sizes = [4, 10, 16], strides = [1, 1, 1]} : vector<4x10x18xf32> to vector<4x10x16xf32>
    %52 = vector.extract_strided_slice %51 {offsets = [0, 0, 0], sizes = [4, 8, 16], strides = [1, 1, 1]} : vector<4x10x16xf32> to vector<4x8x16xf32>
    %53 = vector.extract_strided_slice %5 {offsets = [0, 2, 0], sizes = [1, 1, 4], strides = [1, 1, 1]} : vector<3x3x4xf32> to vector<1x1x4xf32>
    %54 = vector.shape_cast %53 : vector<1x1x4xf32> to vector<4xf32>
    %55 = vector.shape_cast %54 : vector<4xf32> to vector<4x1x1xf32>
    %56 = vector.broadcast %55 : vector<4x1x1xf32> to vector<4x8x16xf32>
    %57 = arith.mulf %52, %56 : vector<4x8x16xf32>
    %58 = arith.addf %50, %57 : vector<4x8x16xf32>
    %59 = vector.extract_strided_slice %51 {offsets = [0, 1, 0], sizes = [4, 8, 16], strides = [1, 1, 1]} : vector<4x10x16xf32> to vector<4x8x16xf32>
    %60 = vector.extract_strided_slice %5 {offsets = [1, 2, 0], sizes = [1, 1, 4], strides = [1, 1, 1]} : vector<3x3x4xf32> to vector<1x1x4xf32>
    %61 = vector.shape_cast %60 : vector<1x1x4xf32> to vector<4xf32>
    %62 = vector.shape_cast %61 : vector<4xf32> to vector<4x1x1xf32>
    %63 = vector.broadcast %62 : vector<4x1x1xf32> to vector<4x8x16xf32>
    %64 = arith.mulf %59, %63 : vector<4x8x16xf32>
    %65 = arith.addf %58, %64 : vector<4x8x16xf32>
    %66 = vector.extract_strided_slice %51 {offsets = [0, 2, 0], sizes = [4, 8, 16], strides = [1, 1, 1]} : vector<4x10x16xf32> to vector<4x8x16xf32>
    %67 = vector.extract_strided_slice %5 {offsets = [2, 2, 0], sizes = [1, 1, 4], strides = [1, 1, 1]} : vector<3x3x4xf32> to vector<1x1x4xf32>
    %68 = vector.shape_cast %67 : vector<1x1x4xf32> to vector<4xf32>
    %69 = vector.shape_cast %68 : vector<4xf32> to vector<4x1x1xf32>
    %70 = vector.broadcast %69 : vector<4x1x1xf32> to vector<4x8x16xf32>
    %71 = arith.mulf %66, %70 : vector<4x8x16xf32>
    %72 = arith.addf %65, %71 : vector<4x8x16xf32>
    %c0_5 = arith.constant 0 : index
    %c0_6 = arith.constant 0 : index
    %73 = vector.load %arg4[%c0_5, %c0_6] : memref<8x4xf32, #tpu.memory_space<vmem>>, vector<8x4xf32>
    %74 = vector.shape_cast %72 : vector<4x8x16xf32> to vector<4x128xf32>
    %cst_7 = arith.constant dense<0.000000e+00> : vector<8x128xf32>
    %75 = tpu.matmul %73, %74, %cst_7 {dimension_numbers = #tpu.dot_dimension_numbers<[1], [0], [0], [1], [0, 0, 1, 1], [], []>} : vector<8x4xf32>, vector<4x128xf32>, vector<8x128xf32> -> vector<8x128xf32>
    %c0_8 = arith.constant 0 : index
    %c0_9 = arith.constant 0 : index
    %76 = vector.load %arg5[%c0_8, %c0_9] : memref<8x1xf32, #tpu.memory_space<vmem>>, vector<8x1xf32>
    %77 = vector.broadcast %76 : vector<8x1xf32> to vector<8x128xf32>
    %78 = arith.addf %75, %77 : vector<8x128xf32>
    %c0_10 = arith.constant 0 : index
    %c0_11 = arith.constant 0 : index
    %c0_12 = arith.constant 0 : index
    %79 = vector.load %arg6[%c0_10, %c0_11, %c0_12] : memref<1x8x128xf32, #tpu.memory_space<vmem>>, vector<1x8x128xf32>
    %80 = vector.shape_cast %79 : vector<1x8x128xf32> to vector<8x128xf32>
    %81 = vector.shape_cast %78 : vector<8x128xf32> to vector<1x8x128xf32>
    tpu.vector_store %arg6[%c0_10, %c0_11, %c0_12], %81 {strides = array<i32>} : memref<1x8x128xf32, #tpu.memory_space<vmem>>, vector<1x8x128xf32>,
    return
  }
  func.func @transform_0(%arg0: i32, %arg1: i32) -> (i32, i32, i32, i32) {
    %c0_i32 = arith.constant 0 : i32
    %c0_i32_0 = arith.constant 0 : i32
    %c0_i32_1 = arith.constant 0 : i32
    %c0_i32_2 = arith.constant 0 : i32
    return %arg0, %c0_i32, %c0_i32_0, %c0_i32_1 : i32, i32, i32, i32
  }
  func.func @transform_1(%arg0: i32, %arg1: i32) -> (i32, i32, i32) {
    %c0_i32 = arith.constant 0 : i32
    %c0_i32_0 = arith.constant 0 : i32
    %c0_i32_1 = arith.constant 0 : i32
    %c0_i32_2 = arith.constant 0 : i32
    return %c0_i32, %c0_i32_0, %c0_i32_1 : i32, i32, i32
  }
  func.func @transform_2(%arg0: i32, %arg1: i32) -> (i32, i32) {
    %c0_i32 = arith.constant 0 : i32
    %c0_i32_0 = arith.constant 0 : i32
    %c0_i32_1 = arith.constant 0 : i32
    return %c0_i32, %c0_i32_0 : i32, i32
  }
  func.func @transform_3(%arg0: i32, %arg1: i32) -> (i32, i32) {
    %c0_i32 = arith.constant 0 : i32
    %c0_i32_0 = arith.constant 0 : i32
    %c0_i32_1 = arith.constant 0 : i32
    return %c0_i32, %c0_i32_0 : i32, i32
  }
  func.func @transform_4(%arg0: i32, %arg1: i32) -> (i32, i32, i32) {
    %c0_i32 = arith.constant 0 : i32
    %c0_i32_0 = arith.constant 0 : i32
    return %arg0, %c0_i32, %arg1 : i32, i32, i32
  }
}

</mosaic_0001>

<bundles_post_ra>
// kernel: tpu_custom_call.1
= control target key start
LH: loop header
LB: loop body
LE: loop exit
PB: predicated region body
PF: predicated region fallthrough
CT: control target
= control target key end

     0   :  { %9 = vsyncpa [#allocation3], 0  ;;  %s1657_s0 = inlined_call_operand.vmem [shape: f32[2,4,18,18], index: 0, kind: input, shape index: {}]   ;;  %s1658_s1 = inlined_call_operand.vmem [shape: f32[3,3,4], index: 1, kind: input, shape index: {}]   ;;  %s1659_s2 = inlined_call_operand.vmem [shape: f32[8,4], index: 2, kind: input, shape index: {}]   ;;  %s1660_s3 = inlined_call_operand.vmem [shape: f32[8,1], index: 3, kind: input, shape index: {}]   ;;  %s1661_s4 = inlined_call_operand.hbm [shape: f32[2,8,256], index: 4, kind: output, shape index: {}]  }
   0x1   :  { %11 = vsyncpa [#allocation3 + $0x1], 0  ;;  %s1267_s15 = smov 0   ;;  %s1269_s16 = smov 0  }
   0x2   :  { %s1271_s17 = smov 0   ;;  %s1273_s18 = smov 0  }
   0x3   :  { %s1275_s19 = smov 0   ;;  %s1277_s20 = smov 0  }
   0x4   :  { %s1279_s21 = smov 0   ;;  %s1281_s22 = smov 0  }
   0x5 LB: > { %s1022_s23 = sadd.s32 4294967295, %s1225_s22   ;;  %s1023_s24 = sadd.s32 4294967294, %s1225_s22   ;;  %s1225_s22 = sphi %s1281_s22, %s17_s22   ;;  %s1221_s21 = sphi %s1279_s21, %s1670_s21   ;;  %s1217_s20 = sphi %s1277_s20, %s1669_s20   ;;  %s1213_s19 = sphi %s1275_s19, %s1668_s19   ;;  %s1209_s18 = sphi %s1273_s18, %s1667_s18   ;;  %s1205_s17 = sphi %s1271_s17, %s1666_s17   ;;  %s1201_s16 = sphi %s1269_s16, %s1665_s16   ;;  %s1197_s15 = sphi %s1267_s15, %s1664_s15  }
   0x6   : > { %s26_s25 = sadd.s32 1, %s1217_s20  ;;  %s29_s26 = sadd.s32 1, %s1221_s21 }
   0x7   : > { %p27_p0 = scmp.ge.s32.totalorder %s26_s25, 2  ;;  %p137_p1 = scmp.ne.s32.totalorder %s1205_s17, %s1201_s16 }
   0x8   : > { %p138_p2 = scmp.eq.s32.totalorder %s1022_s23, 3  ;;  %p143_p5 = scmp.ne.s32.totalorder %s1201_s16, %s1197_s15 }
   0x9   : > { %s1672_s25 = smov (%p27_p0, %s26_s25), 0  ;;  %s1674_s26 = smov (!%p27_p0, %s29_s26), %s1221_s21 }
   0xa   : > { %s123_s27 = ssub.s32 %s1217_s20, %s1672_s25  ;;  %p1318_p3 = por %p138_p2, %p137_p1 }
   0xb   : > { %p31_p4 = scmp.ge.s32.totalorder %s1674_s26, 2  ;;  %p144_p6 = scmp.eq.s32.totalorder %s1023_s24, 3 }
   0xc   : > { %p1026_p7 = scmp.ge.s32.totalorder %s1225_s22, 1  ;;  %p179_p9 = scmp.lt.s32.totalorder %s1225_s22, 5 }
   0xd   : > { %s1676_s26 = smov (%p31_p4, %s1674_s26), 0  ;;  %p1327_p8 = por %p144_p6, %p143_p5 }
   0xe   : > { %s122_s30 = ssub.s32 %s1221_s21, %s1676_s26  ;;  %s127_s5 = sadd.s32 1, %s1205_s17 }
   0xf   : > { %s124_s6 = sor.u32 %s123_s27, %s122_s30  ;;  %p180_p10 = pnand %p1026_p7, %p179_p9 }
  0x10   : > { %p125_p11 = scmp.eq.s32.totalorder %s124_s6, 0  ;;  %v223_v0 = vlaneseq (!%p180_p10)  ;;  %v221_v2 = vld [vmem:[%s1658_s1 + $0x4] sm:$0x7] (!%p180_p10)  ;;  %v222_v3 = vld [vmem:[%s1658_s1 + $0x8] sm:$0x7] (!%p180_p10)  ;;  %p205_p12 = scmp.lt.s32.totalorder (!%p180_p10), %s1213_s19, 1 }
  0x11   : > { %183 = sbr.rel (%p180_p10) target bundleno = 676 (0x2a4), region = 36  ;;  %v220_v5 = vld [vmem:[%s1658_s1] sm:$0x7] (!%p180_p10)  ;;  %vm293_vm0 = vcmask (!%p180_p10), 1046528   ;;  %s1227_s8 = smov (!%p180_p10), 127   ;;  %vm353_vm1 = vcmask (!%p180_p10), 1045504  }
  0x12   : > { %s1336_s7 = scalar_select %p125_p11, %s1205_s17, %s127_s5  }
  0x13   : > { %v1338_v1 = vshrl.u32 (!%p180_p10), %v223_v0, 7  ;;  %s1029_s5 = sshll.u32 (!%p180_p10), %s1209_s18, 3  ;;  %s1228_s9 = smov (!%p180_p10), 126   ;;  %vm1234_vm2 = vmmov (!%p180_p10), 0   ;;  %vm833_vm3 = vcmask (!%p180_p10), 130048   ;;  %vm835_vm4 = vcmask (!%p180_p10), 261120  }
  0x14   : > { %s1232_s10 = smov (!%p180_p10), 32   ;;  %s1233_s11 = smov (!%p180_p10), 16   ;;  %vm837_vm5 = vcmask (!%p180_p10), 392192   ;;  %vm839_vm6 = vcmask (!%p180_p10), 523264   ;;  %vm841_vm7 = vcmask (!%p180_p10), 654336   ;;  %vm843_vm8 = vcmask (!%p180_p10), 785408  }
  0x15   : > { %v1347_v4 = vsub.s32 (!%p180_p10), 1, %v1338_v1  ;;  %v1354_v7 = vsub.s32 (!%p180_p10), 2, %v1338_v1  ;;  %v1362_v13 = vsub.s32 (!%p180_p10), 0, %v1338_v1  ;;  %v1374_v17 = vsub.s32 (!%p180_p10), 3, %v1338_v1  ;;  %s1235_s12 = smov (!%p180_p10), 64   ;;  %s1237_s13 = smov (!%p180_p10), 48  }
  0x16   : > { %s1239_s27 = smov (!%p180_p10), 80   ;;  %vm845_vm9 = vcmask (!%p180_p10), 916480   ;;  %vm857_vm10 = vcmask (!%p180_p10), 1043456   ;;  %vm853_vm11 = vcmask (!%p180_p10), 31744  }
  0x17   : > { %v424_v6 = vrot.slane (!%p180_p10), %v221_v2, %v1347_v4  ;;  %v491_v8 = vrot.slane (!%p180_p10), %v222_v3, %v1347_v4  ;;  %v377_v9 = vrot.slane (!%p180_p10), %v220_v5, %v1347_v4  ;;  %v605_v10 = vrot.slane (!%p180_p10), %v221_v2, %v1354_v7 }
  0x18   : > { %v558_v11 = vrot.slane %v220_v5, %v1354_v7  ;;  %v672_v12 = vrot.slane %v222_v3, %v1354_v7  ;;  %v257_v14 = vrot.slane %v221_v2, %v1362_v13  ;;  %v317_v15 = vrot.slane %v222_v3, %v1362_v13  ;;  %s206_s14 = scalar_select %p205_p12, %s1213_s19, 1 }
  0x19   : > { %426 = vbcast.lane.b32.xlu0 %v424_v6, 256  ;;  %493 = vbcast.lane.b32.xlu1 %v491_v8, 256  ;;  %v226_v16 = vrot.slane %v220_v5, %v1362_v13 }
  0x1a   : > { %s1044_s23 = smul.u32 96, %s206_s14  ;;  %s1238_s14 = smov 96  }
  0x1c   : > { %s209_s30 = scalar_lea.vmem %s1657_s0, %s1044_s23 }
  0x1d   : > { %379 = vbcast.lane.b32.xlu0 %v377_v9, 256  ;;  %607 = vbcast.lane.b32.xlu1 %v605_v10, 256  ;;  %s211_s6 = scalar_lea.vmem %s209_s30, %s1029_s5  ;;  %s1240_s30 = smov 112  }
  0x1e   : > { %v1376_v19 = vld [vmem:[%s211_s6 + $0x18] sm:$0xff]  ;;  %v1378_v20 = vld [vmem:[%s211_s6 + $0x20] sm:$0x3]  ;;  %v1385_v26 = vld [vmem:[%s211_s6 + $0x8] sm:$0x3] }
  0x1f   : > { %v1383_v25 = vld [vmem:[%s211_s6] sm:$0xff]  ;;  %v1387_v27 = vld [vmem:[%s211_s6 + $0x48] sm:$0xff]  ;;  %v1391_v30 = vld [vmem:[%s211_s6 + $0x50] sm:$0x3] }
  0x20   : > { %v1397_v36 = vld [vmem:[%s211_s6 + $0x30] sm:$0xff]  ;;  %v1401_v39 = vld [vmem:[%s211_s6 + $0x38] sm:$0x3] }
  0x21   : > { %560 = vbcast.lane.b32.xlu0 %v558_v11, 256  ;;  %674 = vbcast.lane.b32.xlu1 %v672_v12, 256 }
  0x25   : > { %259 = vbcast.lane.b32.xlu0 %v257_v14, 256  ;;  %319 = vbcast.lane.b32.xlu1 %v317_v15, 256 }
  0x29   : > { %228 = vbcast.lane.b32.xlu0 %v226_v16, 256 }
  0x8b   : > { %v427_v18 = vpop.permute.xlu0 %426  ;;  %v494_v23 = vpop.permute.xlu1 %493 }
  0x8c   : > { %v431_v21 = vrot.slane %v427_v18, %v1362_v13  ;;  %v435_v22 = vrot.slane %v427_v18, %v1347_v4  ;;  %v443_v24 = vrot.slane %v427_v18, %v1374_v17  ;;  %v439_v31 = vrot.slane %v427_v18, %v1354_v7 }
  0x8d   : > { %v498_v33 = vrot.slane %v494_v23, %v1362_v13  ;;  %v502_v49 = vrot.slane %v494_v23, %v1347_v4  ;;  %v506_v50 = vrot.slane %v494_v23, %v1354_v7  ;;  %v510_v55 = vrot.slane %v494_v23, %v1374_v17 }
  0x8e   : > { %v446_v28 = vmul.f32 %v435_v22, %v1376_v19  ;;  %v447_v29 = vmul.f32 %v435_v22, %v1378_v20  ;;  %v444_v37 = vmul.f32 %v431_v21, %v1383_v25  ;;  %v445_v38 = vmul.f32 %v431_v21, %v1385_v26 }
  0x8f   : > { %v380_v32 = vpop.permute.xlu0 %379  ;;  %v450_v42 = vmul.f32 %v443_v24, %v1387_v27  ;;  %v451_v43 = vmul.f32 %v443_v24, %v1391_v30  ;;  %v448_v51 = vmul.f32 %v439_v31, %v1397_v36  ;;  %v449_v52 = vmul.f32 %v439_v31, %v1401_v39  ;;  %v608_v6 = vpop.permute.xlu1 %607 }
  0x90   : > { %v384_v34 = vrot.slane %v380_v32, %v1362_v13  ;;  %v388_v35 = vrot.slane %v380_v32, %v1347_v4  ;;  %v392_v40 = vrot.slane %v380_v32, %v1354_v7  ;;  %v396_v41 = vrot.slane %v380_v32, %v1374_v17 }
  0x91   : > { %v463_v46 = vrot.slane %v446_v28, 1  ;;  %v464_v47 = vrot.slane %v447_v29, 1  ;;  %v460_v58 = vrot.slane %v444_v37, 1  ;;  %v461_v59 = vrot.slane %v445_v38, 1 }
  0x92   : > { %v398_v44 = vmul.f32 %v388_v35, %v1376_v19  ;;  %v397_v45 = vmul.f32 %v384_v34, %v1383_v25  ;;  %v400_v56 = vmul.f32 %v396_v41, %v1387_v27  ;;  %v399_v57 = vmul.f32 %v392_v40, %v1397_v36 }
  0x93   : > { %v561_v48 = vpop.permute.xlu0 %560  ;;  %v1422_v61 = vsel %vm293_vm0, %v463_v46, %v464_v47  ;;  %v469_v62 = vrot.slane %v450_v42, 1  ;;  %v470_v63 = vrot.slane %v451_v43, 1  ;;  %v466_v3 = vrot.slane %v448_v51, 1  ;;  %v675_v31 = vpop.permute.xlu1 %674 }
  0x94   : > { %407 = vrot.lane.b32.xlu0 %v398_v44, %s1227_s8  ;;  %405 = vrot.lane.b32.xlu1 %v397_v45, %s1227_s8  ;;  %v565_v53 = vrot.slane %v561_v48, %v1362_v13  ;;  %v569_v54 = vrot.slane %v561_v48, %v1347_v4  ;;  %v573_v60 = vrot.slane %v561_v48, %v1354_v7  ;;  %v467_v5 = vrot.slane %v449_v52, 1 }
  0x95   : > { %v577_v0 = vrot.slane %v561_v48, %v1374_v17  ;;  %v513_v9 = vmul.f32 %v502_v49, %v1376_v19  ;;  %v514_v10 = vmul.f32 %v502_v49, %v1378_v20  ;;  %v462_v11 = vsel %vm293_vm0, %v460_v58, %v461_v59 }
  0x96   : > { %v579_v2 = vmul.f32 %v569_v54, %v1376_v19  ;;  %v578_v8 = vmul.f32 %v565_v53, %v1383_v25  ;;  %v511_v12 = vmul.f32 %v498_v33, %v1383_v25  ;;  %v512_v14 = vmul.f32 %v498_v33, %v1385_v26 }
  0x97   : > { %v517_v15 = vmul.f32 %v510_v55, %v1387_v27  ;;  %v580_v16 = vmul.f32 %v573_v60, %v1397_v36  ;;  %v1437_v18 = vsel %vm293_vm0, %v469_v62, %v470_v63  ;;  %v612_v21 = vrot.slane %v608_v6, %v1362_v13 }
  0x98   : > { %411 = vrot.lane.b32.xlu0 %v400_v56, %s1227_s8  ;;  %409 = vrot.lane.b32.xlu1 %v399_v57, %s1227_s8  ;;  %v616_v22 = vrot.slane %v608_v6, %v1347_v4  ;;  %v581_v23 = vmul.f32 %v577_v0, %v1387_v27  ;;  %v468_v24 = vsel %vm293_vm0, %v466_v3, %v467_v5  ;;  %v530_v32 = vrot.slane %v513_v9, 2  ;;  %v260_v5 = vpop.permute.xlu0 %259 }
  0x99   : > { %v620_v28 = vrot.slane %v608_v6, %v1354_v7  ;;  %v624_v29 = vrot.slane %v608_v6, %v1374_v17  ;;  %v531_v33 = vrot.slane %v514_v10, 2  ;;  %v518_v34 = vmul.f32 %v510_v55, %v1391_v30 }
  0x9a   : > { %v515_v35 = vmul.f32 %v506_v50, %v1397_v36  ;;  %v527_v37 = vrot.slane %v511_v12, 2  ;;  %v528_v38 = vrot.slane %v512_v14, 2  ;;  %v536_v40 = vrot.slane %v517_v15, 2 }
  0x9b   : > { %v516_v41 = vmul.f32 %v506_v50, %v1401_v39  ;;  %v683_v42 = vrot.slane %v675_v31, %v1347_v4  ;;  %v627_v43 = vmul.f32 %v616_v22, %v1376_v19  ;;  %v628_v44 = vmul.f32 %v616_v22, %v1378_v20 }
  0x9c   : > { %588 = vrot.lane.b32.xlu0 %v579_v2, %s1228_s9  ;;  %586 = vrot.lane.b32.xlu1 %v578_v8, %s1228_s9  ;;  %v625_v45 = vmul.f32 %v612_v21, %v1383_v25  ;;  %v626_v46 = vmul.f32 %v612_v21, %v1385_v26  ;;  %v631_v47 = vmul.f32 %v624_v29, %v1387_v27  ;;  %v537_v51 = vrot.slane %v518_v34, 2 }
  0x9d   : > { %v632_v48 = vmul.f32 %v624_v29, %v1391_v30  ;;  %v629_v49 = vmul.f32 %v620_v28, %v1397_v36  ;;  %v532_v50 = vsel %vm353_vm1, %v530_v32, %v531_v33  ;;  %v533_v52 = vrot.slane %v515_v35, 2 }
  0x9e   : > { %v630_v53 = vmul.f32 %v620_v28, %v1401_v39  ;;  %v534_v54 = vrot.slane %v516_v41, 2  ;;  %v679_v55 = vrot.slane %v675_v31, %v1362_v13  ;;  %v644_v56 = vrot.slane %v627_v43, 1  ;;  %v320_v43 = vpop.permute.xlu1 %319 }
  0x9f   : > { %v645_v57 = vrot.slane %v628_v44, 1  ;;  %v641_v58 = vrot.slane %v625_v45, 1  ;;  %v642_v59 = vrot.slane %v626_v46, 1  ;;  %v650_v60 = vrot.slane %v631_v47, 1 }
  0xa0   : > { %592 = vrot.lane.b32.xlu0 %v581_v23, %s1228_s9  ;;  %590 = vrot.lane.b32.xlu1 %v580_v16, %s1228_s9  ;;  %v651_v62 = vrot.slane %v632_v48, 1  ;;  %v691_v63 = vrot.slane %v675_v31, %v1374_v17  ;;  %v647_v0 = vrot.slane %v629_v49, 1  ;;  %v648_v2 = vrot.slane %v630_v53, 1  ;;  %v229_v48 = vpop.permute.xlu0 %228 }
  0xa1   : > { %v1465_v3 = vmul.f32 %v683_v42, %v1376_v19  ;;  %v529_v6 = vsel %vm353_vm1, %v527_v37, %v528_v38  ;;  %v538_v8 = vsel %vm353_vm1, %v536_v40, %v537_v51  ;;  %v1473_v9 = vmul.f32 %v683_v42, %v1378_v20 }
  0xa2   : > { %v535_v10 = vsel %vm353_vm1, %v533_v52, %v534_v54  ;;  %v1477_v12 = vrot.slane %v675_v31, %v1354_v7  ;;  %v1480_v14 = vsel %vm293_vm0, %v644_v56, %v645_v57  ;;  %v1483_v15 = vmul.f32 %v679_v55, %v1383_v25 }
  0xa3   : > { %v1492_v16 = vmul.f32 %v679_v55, %v1385_v26  ;;  %v264_v21 = vrot.slane %v260_v5, %v1362_v13  ;;  %v1496_v22 = vsel %vm293_vm0, %v647_v0, %v648_v2  ;;  %v711_v23 = vrot.slane %v1465_v3, 2 }
  0xa4   : > { %474 = vrot.lane.b32.xlu0 %v1422_v61, %s1227_s8  ;;  %472 = vrot.lane.b32.xlu1 %v462_v11, %s1227_s8  ;;  %v1486_v61 = vsel %vm293_vm0, %v641_v58, %v642_v59  ;;  %v1489_v11 = vsel %vm293_vm0, %v650_v60, %v651_v62  ;;  %v1500_v28 = vmul.f32 %v691_v63, %v1387_v27  ;;  %v712_v31 = vrot.slane %v1473_v9, 2 }
  0xa5   : > { %v268_v29 = vrot.slane %v260_v5, %v1347_v4  ;;  %v272_v32 = vrot.slane %v260_v5, %v1354_v7  ;;  %v276_v33 = vrot.slane %v260_v5, %v1374_v17  ;;  %v277_v34 = vmul.f32 %v264_v21, %v1383_v25 }
  0xa6   : > { %v708_v35 = vrot.slane %v1483_v15, 2  ;;  %v278_v37 = vmul.f32 %v264_v21, %v1385_v26  ;;  %v1519_v44 = vmul.f32 %v691_v63, %v1391_v30  ;;  %v324_v55 = vrot.slane %v320_v43, %v1362_v13 }
  0xa7   : > { %v279_v38 = vmul.f32 %v268_v29, %v1376_v19  ;;  %v280_v40 = vmul.f32 %v268_v29, %v1378_v20  ;;  %v282_v41 = vmul.f32 %v272_v32, %v1401_v39  ;;  %v283_v42 = vmul.f32 %v276_v33, %v1387_v27 }
  0xa8   : > { %478 = vrot.lane.b32.xlu0 %v1437_v18, %s1227_s8  ;;  %476 = vrot.lane.b32.xlu1 %v468_v24, %s1227_s8  ;;  %v709_v18 = vrot.slane %v1492_v16, 2  ;;  %v281_v24 = vmul.f32 %v272_v32, %v1397_v36  ;;  %v284_v45 = vmul.f32 %v276_v33, %v1391_v30  ;;  %v294_v46 = vrot.slane %v277_v34, 1 }
  0xa9   : > { %v295_v47 = vrot.slane %v278_v37, 1  ;;  %v297_v49 = vrot.slane %v279_v38, 1  ;;  %v298_v51 = vrot.slane %v280_v40, 1  ;;  %v301_v53 = vrot.slane %v282_v41, 1 }
  0xaa   : > { %v300_v52 = vrot.slane %v281_v24, 1  ;;  %v303_v54 = vrot.slane %v283_v42, 1  ;;  %v328_v56 = vrot.slane %v320_v43, %v1347_v4  ;;  %v332_v57 = vrot.slane %v320_v43, %v1354_v7 }
  0xab   : > { %v336_v58 = vrot.slane %v320_v43, %v1374_v17  ;;  %v233_v59 = vrot.slane %v229_v48, %v1362_v13  ;;  %v237_v60 = vrot.slane %v229_v48, %v1347_v4  ;;  %v337_v62 = vmul.f32 %v324_v55, %v1383_v25 }
  0xac   : > { %541 = vrot.lane.b32.xlu0 %v532_v50, %s1227_s8  ;;  %539 = vrot.lane.b32.xlu1 %v529_v6, %s1227_s8  ;;  %v241_v50 = vrot.slane %v229_v48, %v1354_v7  ;;  %v338_v63 = vmul.f32 %v324_v55, %v1385_v26  ;;  %v339_v0 = vmul.f32 %v328_v56, %v1376_v19  ;;  %v304_v5 = vrot.slane %v284_v45, 1 }
  0xad   : > { %v340_v2 = vmul.f32 %v328_v56, %v1378_v20  ;;  %v341_v6 = vmul.f32 %v332_v57, %v1397_v36  ;;  %v342_v13 = vmul.f32 %v332_v57, %v1401_v39  ;;  %v343_v4 = vmul.f32 %v336_v58, %v1387_v27 }
  0xae   : > { %v344_v7 = vmul.f32 %v336_v58, %v1391_v30  ;;  %v245_v21 = vrot.slane %v229_v48, %v1374_v17  ;;  %v247_v29 = vmul.f32 %v237_v60, %v1376_v19  ;;  %v299_v20 = vsel %vm293_vm0, %v297_v49, %v298_v51 }
  0xaf   : > { %v358_v26 = vrot.slane %v340_v2, 2  ;;  %v357_v32 = vrot.slane %v339_v0, 2  ;;  %v296_v34 = vsel %vm293_vm0, %v294_v46, %v295_v47  ;;  %v354_v37 = vrot.slane %v337_v62, 2 }
  0xb0   : > { %545 = vrot.lane.b32.xlu0 %v538_v8, %s1227_s8  ;;  %543 = vrot.lane.b32.xlu1 %v535_v10, %s1227_s8  ;;  %v355_v8 = vrot.slane %v338_v63, 2  ;;  %v246_v10 = vmul.f32 %v233_v59, %v1383_v25  ;;  %v311_v33 = vadd.f32 %v299_v20, %v247_v29  ;;  %v249_v38 = vmul.f32 %v245_v21, %v1387_v27  ;;  %s202_s8 = sand.u32 1, %s1201_s16  }
  0xb1   : > { %v359_v17 = vsel %vm353_vm1, %v357_v32, %v358_v26  ;;  %v305_v30 = vsel %vm293_vm0, %v303_v54, %v304_v5  ;;  %v363_v40 = vrot.slane %v343_v4, 2  ;;  %v364_v42 = vrot.slane %v344_v7, 2 }
  0xb2   : > { %v310_v19 = vadd.f32 %v296_v34, %v246_v10  ;;  %v371_v24 = vadd.f32 %v359_v17, %v311_v33  ;;  %v356_v25 = vsel %vm353_vm1, %v354_v37, %v355_v8  ;;  %v313_v41 = vadd.f32 %v305_v30, %v249_v38 }
  0xb3   : > { %v248_v27 = vmul.f32 %v241_v50, %v1397_v36  ;;  %v302_v45 = vsel %vm293_vm0, %v300_v52, %v301_v53  ;;  %v697_v46 = vmul.f32 %v1477_v12, %v1401_v39  ;;  %v365_v47 = vsel %vm353_vm1, %v363_v40, %v364_v42 }
  0xb4   : > { %655 = vrot.lane.b32.xlu0 %v1480_v14, %s1228_s9  ;;  %653 = vrot.lane.b32.xlu1 %v1486_v61, %s1228_s9  ;;  %v370_v43 = vadd.f32 %v356_v25, %v310_v19  ;;  %v360_v14 = vrot.slane %v341_v6, 2  ;;  %v696_v61 = vmul.f32 %v1477_v12, %v1397_v36  ;;  %v361_v48 = vrot.slane %v342_v13, 2 }
  0xb5   : > { %v373_v49 = vadd.f32 %v365_v47, %v313_v41  ;;  %v312_v51 = vadd.f32 %v302_v45, %v248_v27  ;;  %v713_v36 = vsel %vm353_vm1, %v711_v23, %v712_v31  ;;  %v710_v39 = vsel %vm353_vm1, %v708_v35, %v709_v18 }
  0xb6   : > { %v362_v12 = vsel %vm353_vm1, %v360_v14, %v361_v48  ;;  %v717_v52 = vrot.slane %v1500_v28, 2  ;;  %v714_v53 = vrot.slane %v696_v61, 2  ;;  %v715_v54 = vrot.slane %v697_v46, 2 }
  0xb7   : > { %v1229_v3 = vmov 0.0   ;;  %v1230_v8 = vmov 1983009808   ;;  %v1231_v40 = vmov 1934713408  }
  0xb8   : > { %659 = vrot.lane.b32.xlu0 %v1489_v11, %s1228_s9  ;;  %657 = vrot.lane.b32.xlu1 %v1496_v22, %s1228_s9  ;;  %v372_v11 = vadd.f32 %v362_v12, %v312_v51  ;;  %v718_v22 = vrot.slane %v1519_v44, 2  ;;  %v716_v15 = vsel %vm353_vm1, %v714_v53, %v715_v54  ;;  %v740_v10 = vunpack.c.l.s4 %v1230_v8 }
  0xb9   : > { %1039 = vmatprep.subr.mxu0 %v1229_v3  ;;  %1041 = vmatprep.mubr.msk.f32.mxu0 %vm1234_vm2, %v1229_v3 }
  0xba   : > { %v719_v9 = vsel %vm353_vm1, %v717_v52, %v718_v22  ;;  %v741_v30 = vunpack.c.0.s8 %v740_v10 }
  0xbc   : > { %722 = vrot.lane.b32.xlu0 %v713_v36, %s1228_s9  ;;  %720 = vrot.lane.b32.xlu1 %v710_v39, %s1228_s9  ;;  %v744_v46 = vsub.s32 %v741_v30, %v1338_v1 }
  0xc0   : > { %726 = vrot.lane.b32.xlu0 %v719_v9, %s1228_s9  ;;  %724 = vrot.lane.b32.xlu1 %v716_v15, %s1228_s9  ;;  %s1027_s9 = sshll.u32 %s202_s8, 3 }
 0x106   : > { %v408_v16 = vpop.permute.xlu0 %407  ;;  %v406_v23 = vpop.permute.xlu1 %405 }
 0x107   : > { %v418_v5 = vadd.f32 %v408_v16, %v371_v24  ;;  %v417_v6 = vadd.f32 %v406_v23, %v370_v43  ;;  %v772_v24 = vunpack.c.l.s4 %v1231_v40 }
 0x10a   : > { %v412_v28 = vpop.permute.xlu0 %411  ;;  %v410_v31 = vpop.permute.xlu1 %409 }
 0x10b   : > { %v420_v13 = vadd.f32 %v412_v28, %v373_v49  ;;  %v419_v4 = vadd.f32 %v410_v31, %v372_v11  ;;  %v773_v49 = vunpack.c.0.s8 %v772_v24 }
 0x10d   : > { %v776_v54 = vsub.s32 %v773_v49, %v1338_v1 }
 0x10e   : > { %v589_v35 = vpop.permute.xlu0 %588  ;;  %v587_v18 = vpop.permute.xlu1 %586 }
 0x112   : > { %v593_v44 = vpop.permute.xlu0 %592  ;;  %v591_v55 = vpop.permute.xlu1 %590 }
 0x116   : > { %v475_v56 = vpop.permute.xlu0 %474  ;;  %v473_v57 = vpop.permute.xlu1 %472 }
 0x117   : > { %v485_v7 = vadd.f32 %v475_v56, %v418_v5  ;;  %v484_v21 = vadd.f32 %v473_v57, %v417_v6 }
 0x11a   : > { %v479_v58 = vpop.permute.xlu0 %478  ;;  %v477_v59 = vpop.permute.xlu1 %476 }
 0x11b   : > { %v487_v26 = vadd.f32 %v479_v58, %v420_v13  ;;  %v486_v29 = vadd.f32 %v477_v59, %v419_v4  ;;  %v1236_v58 = vmov 0  }
 0x11c   : > { %1130 = vset.pattern.permute.xlu0 %v1236_v58 }
 0x11e   : > { %v542_v60 = vpop.permute.xlu0 %541  ;;  %v540_v50 = vpop.permute.xlu1 %539 }
 0x11f   : > { %v552_v33 = vadd.f32 %v542_v60, %v485_v7  ;;  %v551_v34 = vadd.f32 %v540_v50, %v484_v21  ;;  %v847_v50 = vld [vmem:[%s1660_s3] sm:$0xff] }
 0x121   : > { %v599_v25 = vadd.f32 %v589_v35, %v552_v33  ;;  %v598_v41 = vadd.f32 %v587_v18, %v551_v34 }
 0x122   : > { %v546_v62 = vpop.permute.xlu0 %545  ;;  %v544_v63 = vpop.permute.xlu1 %543 }
 0x123   : > { %v554_v37 = vadd.f32 %v546_v62, %v487_v26  ;;  %v553_v38 = vadd.f32 %v544_v63, %v486_v29 }
 0x125   : > { %v601_v42 = vadd.f32 %v593_v44, %v554_v37  ;;  %v600_v43 = vadd.f32 %v591_v55, %v553_v38 }
 0x126   : > { %v656_v0 = vpop.permute.xlu0 %655  ;;  %v654_v2 = vpop.permute.xlu1 %653 }
 0x127   : > { %v666_v27 = vadd.f32 %v656_v0, %v599_v25  ;;  %v665_v45 = vadd.f32 %v654_v2, %v598_v41 }
 0x12a   : > { %v660_v20 = vpop.permute.xlu0 %659  ;;  %v658_v32 = vpop.permute.xlu1 %657 }
 0x12b   : > { %v668_v14 = vadd.f32 %v660_v20, %v601_v42  ;;  %v667_v61 = vadd.f32 %v658_v32, %v600_v43  ;;  %v736_v32 = vld [vmem:[%s1659_s2] sm:$0xff] }
 0x12e   : > { %v723_v17 = vpop.permute.xlu0 %722  ;;  %v721_v19 = vpop.permute.xlu1 %720 }
 0x12f   : > { %v733_v51 = vadd.f32 %v723_v17, %v666_v27  ;;  %v732_v36 = vadd.f32 %v721_v19, %v665_v45 }
 0x132   : > { %v727_v47 = vpop.permute.xlu0 %726  ;;  %v725_v48 = vpop.permute.xlu1 %724 }
 0x133   : > { %v735_v39 = vadd.f32 %v727_v47, %v668_v14  ;;  %v734_v12 = vadd.f32 %v725_v48, %v667_v61 }
 0x135   : > { %v753_v11 = vcombine.low %v733_v51, %v735_v39  ;;  %v754_v52 = vcombine.high %v733_v51, %v735_v39  ;;  %v737_v22 = vcombine.low %v732_v36, %v734_v12  ;;  %v738_v53 = vcombine.high %v732_v36, %v734_v12 }
 0x137   : > { %v761_v9 = vrot.slane %v753_v11, %v744_v46  ;;  %v768_v15 = vrot.slane %v754_v52, %v744_v46  ;;  %v745_v16 = vrot.slane %v737_v22, %v744_v46  ;;  %v752_v23 = vrot.slane %v738_v53, %v744_v46 }
 0x139   : > { %v769_v28 = vcombine.low %v745_v16, %v761_v9  ;;  %v770_v31 = vcombine.high %v745_v16, %v761_v9  ;;  %v785_v35 = vcombine.low %v752_v23, %v768_v15  ;;  %v786_v18 = vcombine.high %v752_v23, %v768_v15 }
 0x13b   : > { %v784_v44 = vrot.slane %v770_v31, %v776_v54  ;;  %v777_v55 = vrot.slane %v769_v28, %v776_v54  ;;  %v793_v57 = vrot.slane %v785_v35, %v776_v54  ;;  %v800_v59 = vrot.slane %v786_v18, %v776_v54 }
 0x13d   : > { %810 = vrot.lane.b32.xlu0 %v784_v44, %s1232_s10  ;;  %v801_v56 = vcombine.high %v777_v55, %v1229_v3  ;;  %v802_v1 = vcombine.high %v784_v44, %v1229_v3  ;;  %v803_v60 = vcombine.high %v793_v57, %v1229_v3  ;;  %v804_v62 = vcombine.high %v800_v59, %v1229_v3  ;;  %s1033_s10 = sshll.u32 %s1213_s19, 1  ;;  %s933_s19 = scalar_lea.sflag [#allocation3], %s202_s8 }
 0x13f   : > { %806 = vrot.lane.b32.xlu1 %v801_v56, %s1233_s11  ;;  %s944_s11 = sadd.s32 %s1209_s18, %s1033_s10 }
 0x141   : > { %818 = vrot.lane.b32.xlu0 %v793_v57, %s1235_s12  ;;  %s1034_s12 = sshll.u32 %s944_s11, 7 }
 0x143   : > { %814 = vrot.lane.b32.xlu1 %v802_v1, %s1237_s13  ;;  %s204_s13 = scalar_lea.vmem [#allocation2], %s1027_s9 }
 0x145   : > { %826 = vrot.lane.b32.xlu0 %v800_v59, %s1238_s14  ;;  %s948_s14 = sshll.u32 %s204_s13, 4  ;;  %s1606_s14 = int_to_ptr.vmem [resolvable:$true] %s948_s14 }
 0x146   : > { %s1131_s18 = scalar_lea.vmem %s1606_s14, 128 }
 0x147   : > { %822 = vrot.lane.b32.xlu1 %v803_v60, %s1239_s27  ;;  %s1604_s27 = scalar_lea.hbm %s1661_s4, %s1034_s12  ;;  %p1132_p13 = scmp.ne.s32.totalorder %s1606_s14, %s1131_s18 }
 0x149   : > { %850 = vperm.xlu0 %1130, %v847_v50   ;;  %p1133_p0 = pnand %p1132_p13, %p1318_p3 }
 0x14b   : > { %830 = vrot.lane.b32.xlu1 %v804_v62, %s1240_s30  ;;  %p1134_p1 = pneg %p1133_p0  ;;  %s1241_s30 = smov [#allocation2]  }
 0x14c   : > { %s1135_s5 = sshll.u32 %s1241_s30, 4  ;;  %s1136_s5 = int_to_ptr.vmem [resolvable:$false] %s1135_s5 }
 0x14d   : > { %s1137_s6 = scalar_lea.vmem %s1136_s5, 256  ;;  %p1138_p2 = scmp.lt.s32.totalorder %s1606_s14, %s1136_s5 }
 0x14e   : > { %p1139_p4 = scmp.lt.s32.totalorder %s1137_s6, %s1131_s18 }
 0x150   : > { %p1140_p5 = por %p1139_p4, %p1138_p2 }
 0x152   : > { %p1141_p6 = pnand %p1140_p5, %p1134_p1 }
 0x1af   : > { %v811_v63 = vpop.permute.xlu0 %810 }
 0x1b1   : > { %v807_v0 = vpop.permute.xlu1 %806 }
 0x1b2   : > { %v834_v2 = vsel %vm833_vm3, %v777_v55, %v807_v0 }
 0x1b3   : > { %v836_v5 = vsel %vm835_vm4, %v834_v2, %v811_v63  ;;  %v819_v13 = vpop.permute.xlu0 %818 }
 0x1b5   : > { %v815_v6 = vpop.permute.xlu1 %814 }
 0x1b6   : > { %v838_v4 = vsel %vm837_vm5, %v836_v5, %v815_v6 }
 0x1b7   : > { %v840_v7 = vsel %vm839_vm6, %v838_v4, %v819_v13  ;;  %v827_v26 = vpop.permute.xlu0 %826 }
 0x1b9   : > { %v823_v21 = vpop.permute.xlu1 %822 }
 0x1ba   : > { %v842_v3 = vsel %vm841_vm7, %v840_v7, %v823_v21 }
 0x1bb   : > { %v844_v20 = vsel %vm843_vm8, %v842_v3, %v827_v26 }
 0x1bd   : > { %v831_v29 = vpop.permute.xlu1 %830 }
 0x1be   : > { %v846_v8 = vsel %vm845_vm9, %v844_v20, %v831_v29 }
 0x1bf   : > { %1040 = vmatpush3.msk.msra.mxu0 %vm857_vm10, %v846_v8 }
 0x1c0   : > { %1042 = vmatmul.mubr.msk.f32.vlgmr.msra.gmra.mrb[0].mxu0 %vm853_vm11, %v736_v32 }
 0x1c8   : > { %v851_v10 = vpop.permute.xlu0 %850 }
 0x293   : > { %v927_v33 = vpop.f32.mrb[0].mxu0 }
 0x294   : > { %v928_v34 = vadd.f32 %v927_v33, %v851_v10  ;;  %v1043_v37 = vpop.f32.mrb[1].mxu0 }
 0x296   : > { %931 = vst [vmem:[%s204_s13] sm:$0xff] %v928_v34 }
 0x297   : > { %1144 = shalt.err (!%p1141_p6)
}
 0x298   : > { %s1145_s8 = scalar_lea.hbm %s1604_s27, 128  ;;  %s1149_s11 = scalar_lea.hbm %s1661_s4, 512 }
 0x299   : > { %p1146_p7 = scmp.ne.s32.totalorder %s1604_s27, %s1145_s8  ;;  %p1150_p11 = scmp.lt.u32.totalorder %s1604_s27, %s1661_s4 }
 0x29a   : > { %p1151_p12 = scmp.lt.u32.totalorder %s1149_s11, %s1145_s8  ;;  %p1153_p0 = scmp.lt.u32.totalorder %s1145_s8, %s1604_s27 }
 0x29b   : > { %p1147_p9 = pnand %p1146_p7, %p1318_p3 }
 0x29c   : > { %p1152_p13 = por %p1151_p12, %p1150_p11 }
 0x29d   : > { %p1148_p10 = pneg %p1147_p9 }
 0x29e   : > { %p1154_p1 = por %p1153_p0, %p1152_p13 }
 0x2a0   : > { %p1155_p2 = pnand %p1154_p1, %p1148_p10 }
 0x2a2   : > { %1158 = shalt.err (!%p1155_p2)
}
 0x2a3   : > { %1045 = dma.vmem_to_hbm [thread:$0]  (%p1318_p3), %s1606_s14, 128, %s1604_s27, %s933_s19  }
 0x2a4 PF: > { %p1051_p4 = scmp.ge.s32.totalorder %s1225_s22, 2  ;;  %s960_s23 = sand.u32 1, %s1197_s15  }
 0x2a5   : > { %s961_s24 = scalar_lea.sflag [#allocation3], %s960_s23 }
 0x2a6   : > { %p1048_p5 = pnand %p1051_p4, %p1327_p8 }
 0x2a8   : > { %1192 = dma.done.wait (!%p1048_p5), %s961_s24, 128  }
 0x2a9   : > { %1194 = vsyncadd (!%p1048_p5), %s961_s24, 4294967168  ;;  %s17_s22 = sadd.s32 1, %s1225_s22   ;;  %s1664_s15 = smov %s1201_s16 }
 0x2aa   : > { %p14_p6 = scmp.ge.s32.totalorder %s17_s22, 6   ;;  %s1665_s16 = smov %s1205_s17 }
 0x2ab   : > { %s1666_s17 = smov %s1336_s7  ;;  %s1667_s18 = smov %s1217_s20 }
 0x2ac   : > { %s1668_s19 = smov %s1221_s21  ;;  %s1669_s20 = smov %s1672_s25 }
 0x2ad   : > { %s1670_s21 = smov %s1676_s26  ;;  %16 = sbr.rel (!%p14_p6) target bundleno = 5 (0x5), region = 72 }
 0x2b4   :  { %966 = vsyncpa [#allocation3], 1 }
 0x2b5   :  { %968 = vsyncpa [#allocation3 + $0x1], 1 }

</bundles_post_ra>
